<compile_context>
chip_gen: v7x
topology: tpu7x:2x2x1
jax: 0.10.0
libtpu: 0.0.40
codegen_flags: <defaults>
</compile_context>

<pallas_src>
import jax
import jax.numpy as jnp
from jax.experimental import pallas as pl
from jax.experimental.pallas import tpu as pltpu

LANE = 128
SUBLANE = 8


def _round_up(n, m):
    return ((n + m - 1) // m) * m


def _out_dim(D):
    """Lane-dense (multiple-of-128) output only when the extra HBM write
    traffic is small (<= ~12.5%). For small D (e.g. 32) a 4x padded writeback
    on a write-bound kernel costs far more than unmasked stores save."""
    D_pad = _round_up(D, LANE)
    if D_pad == D:
        return D, False
    if (D_pad - D) * 8 <= D:
        return D_pad, True
    return D, False


def _vmem_limit_bytes():
    """Per-generation scoped-VMEM limit with headroom for compiler scratch."""
    try:
        cap = int(pltpu.get_tpu_info().vmem_capacity_bytes)
    except Exception:  # conservative fallback sized for v7x (64 MiB/TC)
        cap = 64 * 1024 * 1024
    return max(16 * 1024 * 1024,
               min(cap * 3 // 4, cap - 16 * 1024 * 1024))


def sae_kernel(x_ref,
               w1_ref, b1_ref,
               w2_ref, b2_ref,
               w3_ref, b3_ref,
               w4_ref, b4_ref,
               out_ref):
    """One batch tile of the SAE forward: 4 matmuls + biases + 3 sigmoids.

    x_ref : (TB, D)      f32   streamed per grid step (cast to bf16 in-kernel)
    w1    : (D, 20)      bf16  resident
    w2/w3 : f32          resident (tiny)
    w4    : (20, D_out)  bf16  resident
    b*    : (1, out)     f32   resident
    out   : (TB, D_out)  bf16
    MXU dots on fc1/fc4 are bf16 x bf16 with f32 accumulation; all bias-add
    and sigmoid math stays in f32 (also keeps v5e happy: no bf16 VPU/EUP).
    """
    x = x_ref[...].astype(jnp.bfloat16)          # cast hides under streamed DMA
    h1 = jax.nn.sigmoid(
        jnp.dot(x, w1_ref[...], preferred_element_type=jnp.float32) + b1_ref[...])
    h2 = jax.nn.sigmoid(
        jnp.dot(h1, w2_ref[...], preferred_element_type=jnp.float32) + b2_ref[...])
    h3 = jax.nn.sigmoid(
        jnp.dot(h2, w3_ref[...], preferred_element_type=jnp.float32) + b3_ref[...])
    # Keep fc4 on the MXU bf16 fast path: cast the tiny (TB, 20) h3 instead of
    # upcasting the (20, D_out) weight every grid step.
    h4 = jnp.dot(h3.astype(jnp.bfloat16), w4_ref[...],
                 preferred_element_type=jnp.float32) + b4_ref[...]
    out_ref[...] = h4.astype(out_ref.dtype)


def sae_forward(x, params):
    """x: (B, input_columns) float32.  params: dict of (w_t, b) per layer from
    init_params (w1/w4 bf16; fc4 optionally lane-dense padded)."""
    B, D = x.shape
    w1, b1 = params["fc1"]
    w2, b2 = params["fc2"]
    w3, b3 = params["fc3"]
    w4, b4 = params["fc4"]
    D_out = w4.shape[1]
    padded_out = D_out != D
    assert w1.shape == (D, 20) and w4.shape == (20, D_out)

    vmem_limit = _vmem_limit_bytes()

    # Resident weight footprint; x2 because full blocks are still
    # double-buffered by the pipeline.
    resident = 2 * int(sum(int(w.size) * w.dtype.itemsize +
                           int(b.size) * b.dtype.itemsize
                           for w, b in params.values()))
    # Streamed per-row footprint: double-buffered f32 x tile + bf16 out tile.
    per_row = 2 * D * 4 + 2 * D_out * 2
    budget = vmem_limit - resident - 4 * 1024 * 1024    # compiler-scratch headroom

    # ---- batch-tile choice --------------------------------------------------
    tb = max(16, budget // max(per_row, 1))
    tb = min(tb, 1024)                                   # amortize ~0.35us/step
    # Keep >= ~4 grid steps when the batch allows: v7x has 2 TensorCores on the
    # "parallel" axis and each core still needs >= 2 steps to pipeline DMA.
    tb = min(tb, max(16, (pl.cdiv(B, 4) // 16) * 16))
    tb = max(16, (tb // 16) * 16)                        # bf16 (16,128) packed rows
    tb = min(tb, _round_up(B, SUBLANE))                  # don't exceed the batch
    tb = max(SUBLANE, (tb // SUBLANE) * SUBLANE)
    grid = pl.cdiv(B, tb)                                # ragged last tile is masked

    def full(a):
        nd = a.ndim
        return pl.BlockSpec(a.shape, lambda i: (0,) * nd)

    # TODO(synk): if xprof shows the per-step DMA exposed, add
    # pipeline_mode=pl.Buffered(3) on the streamed x/out BlockSpecs.
    out = pl.pallas_call(
        sae_kernel,
        out_shape=jax.ShapeDtypeStruct((B, D_out), jnp.bfloat16),
        grid=(grid,),
        in_specs=[pl.BlockSpec((tb, D), lambda i: (i, 0)),       # streamed f32 x
                  full(w1), full(b1),                            # resident weights
                  full(w2), full(b2),
                  full(w3), full(b3),
                  full(w4), full(b4)],
        out_specs=pl.BlockSpec((tb, D_out), lambda i: (i, 0)),
        compiler_params=pltpu.CompilerParams(
            dimension_semantics=("parallel",),
            vmem_limit_bytes=int(vmem_limit)),
        cost_estimate=pl.CostEstimate(
            flops=2 * B * (D * 20 + 20 * 10 + 10 * 20 + 20 * D_out),
            transcendentals=B * (20 + 10 + 20),
            bytes_accessed=int(B * D * 4 + B * D_out * 2 + resident // 2)),
    )(x, w1, b1, w2, b2, w3, b3, w4, b4)

    if padded_out:
        out = out[:, :D]      # only the column dim was padded; batch is exact
    return out


def init_params(key, input_columns):
    """nn.Linear-style init (uniform(-1/sqrt(in), 1/sqrt(in))).
    Weights stored transposed: (in_features, out_features). The two large
    weights (fc1, fc4) are carried in bf16; fc4 is zero-padded to a lane-dense
    multiple of 128 columns only when the overhead is small."""
    D = input_columns
    D_out, padded = _out_dim(D)
    dims = [("fc1", D, 20), ("fc2", 20, 10), ("fc3", 10, 20), ("fc4", 20, D)]
    params = {}
    for name, fan_in, fan_out in dims:
        key, kw, kb = jax.random.split(key, 3)
        bound = 1.0 / jnp.sqrt(float(fan_in))
        w_t = jax.random.uniform(kw, (fan_in, fan_out), jnp.float32, -bound, bound)
        b = jax.random.uniform(kb, (1, fan_out), jnp.float32, -bound, bound)
        if name == "fc1":
            w_t = w_t.astype(jnp.bfloat16)
        if name == "fc4":
            if padded:
                w_t = jnp.pad(w_t, ((0, 0), (0, D_out - D)))
                b = jnp.pad(b, ((0, 0), (0, D_out - D)))
            w_t = w_t.astype(jnp.bfloat16)
        params[name] = (w_t, b)
    return params


def sae_reference(x, params, input_columns):
    """Plain-JAX reference computing the same quantized math as the kernel
    (bf16 x/w1/w4 + bf16 h3 for fc4, f32 accumulation / bias / sigmoid)."""
    D = input_columns
    w1, b1 = params["fc1"]
    w2, b2 = params["fc2"]
    w3, b3 = params["fc3"]
    w4, b4 = params["fc4"]
    h = x.astype(jnp.bfloat16)
    h1 = jax.nn.sigmoid(jnp.dot(h, w1, preferred_element_type=jnp.float32) + b1)
    h2 = jax.nn.sigmoid(jnp.dot(h1, w2, preferred_element_type=jnp.float32) + b2)
    h3 = jax.nn.sigmoid(jnp.dot(h2, w3, preferred_element_type=jnp.float32) + b3)
    h4 = jnp.dot(h3.astype(jnp.bfloat16), w4,
                 preferred_element_type=jnp.float32) + b4
    return h4[:, :D]


if __name__ == "__main__":
    input_columns = 32   # stands in for nb_movies in the original recommender
    batch = 8

    key = jax.random.PRNGKey(0)
    key, kx = jax.random.split(key)
    x = jax.random.normal(kx, (batch, input_columns), dtype=jnp.float32)

    params = init_params(key, input_columns)

    out = jax.block_until_ready(sae_forward(x, params))

    ref = sae_reference(x, params, input_columns)
    assert out.shape == (batch, input_columns)
    # Output is bf16 (~0.4% rounding); reference is f32 of the same quantized math.
    assert jnp.allclose(out.astype(jnp.float32), ref, atol=2e-2, rtol=2e-2), \
        "mismatch vs reference"

    print("KERNEL_OK")
</pallas_src>

<mosaic_0001>
module attributes {stable_mosaic.version = 11 : i64} {
  func.func @sae_kernel(%arg0: i32, %arg1: memref<8x32xf32, #tpu.memory_space<vmem>>, %arg2: memref<32x20xbf16, #tpu.memory_space<vmem>>, %arg3: memref<1x20xf32, #tpu.memory_space<vmem>>, %arg4: memref<20x10xf32, #tpu.memory_space<vmem>>, %arg5: memref<1x10xf32, #tpu.memory_space<vmem>>, %arg6: memref<10x20xf32, #tpu.memory_space<vmem>>, %arg7: memref<1x20xf32, #tpu.memory_space<vmem>>, %arg8: memref<20x32xbf16, #tpu.memory_space<vmem>>, %arg9: memref<1x32xf32, #tpu.memory_space<vmem>>, %arg10: memref<8x32xbf16, #tpu.memory_space<vmem>>) attributes {dimension_semantics = [#tpu.dimension_semantics<parallel>], iteration_bounds = array<i64: 1>, scalar_prefetch = 0 : i64, scratch_operands = 0 : i64, tpu.core_type = #tpu.core_type<tc>, window_params = [{transform_indices = @transform_0, window_bounds = array<i64: 8, 32>}, {pipeline_mode = #tpu.pipeline_mode<synchronous>, transform_indices = @transform_1, window_bounds = array<i64: 32, 20>}, {pipeline_mode = #tpu.pipeline_mode<synchronous>, transform_indices = @transform_2, window_bounds = array<i64: 1, 20>}, {pipeline_mode = #tpu.pipeline_mode<synchronous>, transform_indices = @transform_3, window_bounds = array<i64: 20, 10>}, {pipeline_mode = #tpu.pipeline_mode<synchronous>, transform_indices = @transform_4, window_bounds = array<i64: 1, 10>}, {pipeline_mode = #tpu.pipeline_mode<synchronous>, transform_indices = @transform_5, window_bounds = array<i64: 10, 20>}, {pipeline_mode = #tpu.pipeline_mode<synchronous>, transform_indices = @transform_6, window_bounds = array<i64: 1, 20>}, {pipeline_mode = #tpu.pipeline_mode<synchronous>, transform_indices = @transform_7, window_bounds = array<i64: 20, 32>}, {pipeline_mode = #tpu.pipeline_mode<synchronous>, transform_indices = @transform_8, window_bounds = array<i64: 1, 32>}, {transform_indices = @transform_9, window_bounds = array<i64: 8, 32>}]} {
    %c0 = arith.constant 0 : index
    %c0_0 = arith.constant 0 : index
    %0 = vector.load %arg1[%c0, %c0_0] : memref<8x32xf32, #tpu.memory_space<vmem>>, vector<8x32xf32>
    %1 = arith.truncf %0 : vector<8x32xf32> to vector<8x32xbf16>
    %c0_1 = arith.constant 0 : index
    %c0_2 = arith.constant 0 : index
    %2 = vector.load %arg2[%c0_1, %c0_2] : memref<32x20xbf16, #tpu.memory_space<vmem>>, vector<32x20xbf16>
    %cst = arith.constant dense<0.000000e+00> : vector<8x20xf32>
    %3 = tpu.matmul %1, %2, %cst {dimension_numbers = #tpu.dot_dimension_numbers<[1], [0], [0], [1], [0, 0, 1, 1], [], []>} : vector<8x32xbf16>, vector<32x20xbf16>, vector<8x20xf32> -> vector<8x20xf32>
    %c0_3 = arith.constant 0 : index
    %c0_4 = arith.constant 0 : index
    %4 = vector.load %arg3[%c0_3, %c0_4] : memref<1x20xf32, #tpu.memory_space<vmem>>, vector<1x20xf32>
    %5 = vector.broadcast %4 : vector<1x20xf32> to vector<8x20xf32>
    %6 = arith.addf %3, %5 : vector<8x20xf32>
    %7 = arith.negf %6 : vector<8x20xf32>
    %8 = math.exp %7 : vector<8x20xf32>
    %cst_5 = arith.constant 1.000000e+00 : f32
    %9 = vector.broadcast %cst_5 : f32 to vector<8x20xf32>
    %10 = arith.addf %9, %8 : vector<8x20xf32>
    %11 = arith.divf %9, %10 : vector<8x20xf32>
    %c0_6 = arith.constant 0 : index
    %c0_7 = arith.constant 0 : index
    %12 = vector.load %arg4[%c0_6, %c0_7] : memref<20x10xf32, #tpu.memory_space<vmem>>, vector<20x10xf32>
    %cst_8 = arith.constant dense<0.000000e+00> : vector<8x10xf32>
    %13 = tpu.matmul %11, %12, %cst_8 {dimension_numbers = #tpu.dot_dimension_numbers<[1], [0], [0], [1], [0, 0, 1, 1], [], []>} : vector<8x20xf32>, vector<20x10xf32>, vector<8x10xf32> -> vector<8x10xf32>
    %c0_9 = arith.constant 0 : index
    %c0_10 = arith.constant 0 : index
    %14 = vector.load %arg5[%c0_9, %c0_10] : memref<1x10xf32, #tpu.memory_space<vmem>>, vector<1x10xf32>
    %15 = vector.broadcast %14 : vector<1x10xf32> to vector<8x10xf32>
    %16 = arith.addf %13, %15 : vector<8x10xf32>
    %17 = arith.negf %16 : vector<8x10xf32>
    %18 = math.exp %17 : vector<8x10xf32>
    %cst_11 = arith.constant 1.000000e+00 : f32
    %19 = vector.broadcast %cst_11 : f32 to vector<8x10xf32>
    %20 = arith.addf %19, %18 : vector<8x10xf32>
    %21 = arith.divf %19, %20 : vector<8x10xf32>
    %c0_12 = arith.constant 0 : index
    %c0_13 = arith.constant 0 : index
    %22 = vector.load %arg6[%c0_12, %c0_13] : memref<10x20xf32, #tpu.memory_space<vmem>>, vector<10x20xf32>
    %cst_14 = arith.constant dense<0.000000e+00> : vector<8x20xf32>
    %23 = tpu.matmul %21, %22, %cst_14 {dimension_numbers = #tpu.dot_dimension_numbers<[1], [0], [0], [1], [0, 0, 1, 1], [], []>} : vector<8x10xf32>, vector<10x20xf32>, vector<8x20xf32> -> vector<8x20xf32>
    %c0_15 = arith.constant 0 : index
    %c0_16 = arith.constant 0 : index
    %24 = vector.load %arg7[%c0_15, %c0_16] : memref<1x20xf32, #tpu.memory_space<vmem>>, vector<1x20xf32>
    %25 = vector.broadcast %24 : vector<1x20xf32> to vector<8x20xf32>
    %26 = arith.addf %23, %25 : vector<8x20xf32>
    %27 = arith.negf %26 : vector<8x20xf32>
    %28 = math.exp %27 : vector<8x20xf32>
    %cst_17 = arith.constant 1.000000e+00 : f32
    %29 = vector.broadcast %cst_17 : f32 to vector<8x20xf32>
    %30 = arith.addf %29, %28 : vector<8x20xf32>
    %31 = arith.divf %29, %30 : vector<8x20xf32>
    %32 = arith.truncf %31 : vector<8x20xf32> to vector<8x20xbf16>
    %c0_18 = arith.constant 0 : index
    %c0_19 = arith.constant 0 : index
    %33 = vector.load %arg8[%c0_18, %c0_19] : memref<20x32xbf16, #tpu.memory_space<vmem>>, vector<20x32xbf16>
    %cst_20 = arith.constant dense<0.000000e+00> : vector<8x32xf32>
    %34 = tpu.matmul %32, %33, %cst_20 {dimension_numbers = #tpu.dot_dimension_numbers<[1], [0], [0], [1], [0, 0, 1, 1], [], []>} : vector<8x20xbf16>, vector<20x32xbf16>, vector<8x32xf32> -> vector<8x32xf32>
    %c0_21 = arith.constant 0 : index
    %c0_22 = arith.constant 0 : index
    %35 = vector.load %arg9[%c0_21, %c0_22] : memref<1x32xf32, #tpu.memory_space<vmem>>, vector<1x32xf32>
    %36 = vector.broadcast %35 : vector<1x32xf32> to vector<8x32xf32>
    %37 = arith.addf %34, %36 : vector<8x32xf32>
    %38 = arith.truncf %37 : vector<8x32xf32> to vector<8x32xbf16>
    %c0_23 = arith.constant 0 : index
    %c0_24 = arith.constant 0 : index
    %39 = vector.load %arg10[%c0_23, %c0_24] : memref<8x32xbf16, #tpu.memory_space<vmem>>, vector<8x32xbf16>
    tpu.vector_store %arg10[%c0_23, %c0_24], %38 {strides = array<i32>} : memref<8x32xbf16, #tpu.memory_space<vmem>>, vector<8x32xbf16>,
    return
  }
  func.func @transform_0(%arg0: i32) -> (i32, i32) {
    %c0_i32 = arith.constant 0 : i32
    %c0_i32_0 = arith.constant 0 : i32
    return %arg0, %c0_i32 : i32, i32
  }
  func.func @transform_1(%arg0: i32) -> (i32, i32) {
    %c0_i32 = arith.constant 0 : i32
    %c0_i32_0 = arith.constant 0 : i32
    %c0_i32_1 = arith.constant 0 : i32
    return %c0_i32, %c0_i32_0 : i32, i32
  }
  func.func @transform_2(%arg0: i32) -> (i32, i32) {
    %c0_i32 = arith.constant 0 : i32
    %c0_i32_0 = arith.constant 0 : i32
    %c0_i32_1 = arith.constant 0 : i32
    return %c0_i32, %c0_i32_0 : i32, i32
  }
  func.func @transform_3(%arg0: i32) -> (i32, i32) {
    %c0_i32 = arith.constant 0 : i32
    %c0_i32_0 = arith.constant 0 : i32
    %c0_i32_1 = arith.constant 0 : i32
    return %c0_i32, %c0_i32_0 : i32, i32
  }
  func.func @transform_4(%arg0: i32) -> (i32, i32) {
    %c0_i32 = arith.constant 0 : i32
    %c0_i32_0 = arith.constant 0 : i32
    %c0_i32_1 = arith.constant 0 : i32
    return %c0_i32, %c0_i32_0 : i32, i32
  }
  func.func @transform_5(%arg0: i32) -> (i32, i32) {
    %c0_i32 = arith.constant 0 : i32
    %c0_i32_0 = arith.constant 0 : i32
    %c0_i32_1 = arith.constant 0 : i32
    return %c0_i32, %c0_i32_0 : i32, i32
  }
  func.func @transform_6(%arg0: i32) -> (i32, i32) {
    %c0_i32 = arith.constant 0 : i32
    %c0_i32_0 = arith.constant 0 : i32
    %c0_i32_1 = arith.constant 0 : i32
    return %c0_i32, %c0_i32_0 : i32, i32
  }
  func.func @transform_7(%arg0: i32) -> (i32, i32) {
    %c0_i32 = arith.constant 0 : i32
    %c0_i32_0 = arith.constant 0 : i32
    %c0_i32_1 = arith.constant 0 : i32
    return %c0_i32, %c0_i32_0 : i32, i32
  }
  func.func @transform_8(%arg0: i32) -> (i32, i32) {
    %c0_i32 = arith.constant 0 : i32
    %c0_i32_0 = arith.constant 0 : i32
    %c0_i32_1 = arith.constant 0 : i32
    return %c0_i32, %c0_i32_0 : i32, i32
  }
  func.func @transform_9(%arg0: i32) -> (i32, i32) {
    %c0_i32 = arith.constant 0 : i32
    %c0_i32_0 = arith.constant 0 : i32
    return %arg0, %c0_i32 : i32, i32
  }
}

</mosaic_0001>

<bundles_post_ra>
// kernel: tpu_custom_call.1
= control target key start
LH: loop header
LB: loop body
LE: loop exit
PB: predicated region body
PF: predicated region fallthrough
CT: control target
= control target key end

     0   :  { %v493_v1 = vmov 0.0   ;;  %vm494_vm0 = vmmov 0   ;;  %s610_s0 = inlined_call_operand.vmem [shape: f32[8,32], index: 0, kind: input, shape index: {}]   ;;  %s611_s1 = inlined_call_operand.vmem [shape: bf16[32,20], index: 1, kind: input, shape index: {}]   ;;  %s612_s2 = inlined_call_operand.vmem [shape: f32[1,20], index: 2, kind: input, shape index: {}]   ;;  %s613_s3 = inlined_call_operand.vmem [shape: f32[20,10], index: 3, kind: input, shape index: {}]   ;;  %s614_s4 = inlined_call_operand.vmem [shape: f32[1,10], index: 4, kind: input, shape index: {}]   ;;  %s615_s5 = inlined_call_operand.vmem [shape: f32[10,20], index: 5, kind: input, shape index: {}]   ;;  %s616_s6 = inlined_call_operand.vmem [shape: f32[1,20], index: 6, kind: input, shape index: {}]   ;;  %s617_s7 = inlined_call_operand.vmem [shape: bf16[20,32], index: 7, kind: input, shape index: {}]   ;;  %s618_s8 = inlined_call_operand.vmem [shape: f32[1,32], index: 8, kind: input, shape index: {}]   ;;  %s619_s9 = inlined_call_operand.hbm [shape: bf16[8,32], index: 9, kind: output, shape index: {}]  }
   0x1   :  { %v453_v0 = vld [vmem:[%s611_s1] sm:$0xff]   ;;  %409 = vmatprep.subr.bf16.mxu0 %v493_v1  ;;  %v454_v2 = vld [vmem:[%s611_s1 + $0x8] sm:$0xff]   ;;  %413 = vmatprep.mubr.msk.bf16.mxu0 %vm494_vm0, %v493_v1 }
   0x2   :  { %410 = vmatpush3.bf16.msra.mxu0 %v453_v0  ;;  %v34_v3 = vld [vmem:[%s610_s0] sm:$0xff]  ;;  %423 = vmatprep.mubr.msk.f32.mxu1 %vm494_vm0, %v493_v1 }
   0x3   :  { %411 = vmatprep.subr.bf16.mxu0 %v493_v1 }
   0x4   :  { %14 = vsyncpa [#allocation3], 0  ;;  %v35_v4 = vpack.c.bf16 %v34_v3, %v34_v3  ;;  %vm59_vm1 = vcmask 261120   ;;  %v109_v5 = vld [vmem:[%s613_s3] sm:$0xff]  ;;  %v110_v6 = vld [vmem:[%s613_s3 + $0x8] sm:$0xff]  ;;  %v495_v7 = vmov 0.0|0.0  }
   0x5   :  { %441 = vmatprep.subr.bf16.mxu1 %v495_v7  ;;  %v442_v8 = vpack.c.bf16 %v110_v6, %v109_v5  ;;  %v111_v9 = vld [vmem:[%s613_s3 + $0x10] sm:$0xf]  ;;  %vm123_vm2 = vcmask 1043456   ;;  %v379_v10 = vld [vmem:[%s612_s2] ss:$0 sm:$0xff]  ;;  %vm119_vm3 = vcmask 162816  }
   0x6   :  { %412 = vmatpush3.bf16.msra.mxu0 %v454_v2  ;;  %v203_v20 = vld [vmem:[%s615_s5] sm:$0xff]  ;;  %v204_v21 = vld [vmem:[%s615_s5 + $0x8] sm:$0x3]  ;;  %vm216_vm4 = vcmask 1041408   ;;  %vm496_vm5 = vmmov 1   ;;  %vm212_vm7 = vcmask 80896  }
   0x7   :  { %433 = vmatprep.subr.bf16.mxu0 %v493_v1  ;;  %443 = vmatpush3.bf16.msra.mxu1 %v442_v8  ;;  %v445_v22 = vpack.c.bf16 %v204_v21, %v203_v20  ;;  %vm446_vm6 = vmpackc.low %vm216_vm4, %vm496_vm5  ;;  %v384_v23 = vld [vmem:[%s614_s4] ss:$0 sm:$0xff]  ;;  %v456_v32 = vld [vmem:[%s617_s7 + $0x8] ss:$0 sps:$4 sm:$0x33]   ;;  %s497_s30 = smov [#allocation2]  }
   0x8   :  { %421 = vmatprep.subr.mxu1 %v493_v1  ;;  %v455_v31 = vld [vmem:[%s617_s7] sm:$0xff]   ;;  %v320_v33 = vsel %vm216_vm4, %v456_v32, 0  ;;  %s371_s10 = sshll.u32 %s497_s30, 4  ;;  %vm363_vm8 = vcmask 257024   ;;  %s372_s10 = int_to_ptr.vmem [resolvable:$true] %s371_s10 }
   0x9   :  { %414 = vmatmul.mubr.msk.bf16.vlgmr.msra.gmra.mrb[0].mxu0 %vm59_vm1, %v35_v4  ;;  %v388_v34 = vld [vmem:[%s616_s6] ss:$0 sm:$0xff]  ;;  %s469_s6 = scalar_lea.vmem %s372_s10, 64  ;;  %p474_p1 = scmp.lt.s32.totalorder %s372_s10, %s372_s10 }
   0xa   :  { %437 = vmatprep.mubr.msk.bf16.mxu0 %vm494_vm0, %v493_v1  ;;  %434 = vmatpush3.bf16.msra.mxu0 %v455_v31  ;;  %v392_v43 = vld [vmem:[%s618_s8] ss:$0 sm:$0xff]  ;;  %p470_p0 = scmp.ne.s32.totalorder %s372_s10, %s469_s6  ;;  %p475_p2 = scmp.lt.s32.totalorder %s469_s6, %s469_s6 }
   0xb   :  { %422 = vmatpush3.msk.msra.mxu1 %vm123_vm2, %v111_v9  ;;  %435 = vmatprep.subr.bf16.mxu0 %v493_v1 }
   0xc   :  { %444 = vmatprep.subr.bf16.mxu1 %v495_v7  ;;  %p476_p3 = por %p475_p2, %p474_p1 }
   0xe   :  { %436 = vmatpush3.bf16.msra.mxu0 %v320_v33  ;;  %p477_p4 = pnand %p476_p3, %p470_p0 }
  0xdc   :  { %v97_v11 = vpop.f32.mrb[0].mxu0 }
  0xdd   :  { %v98_v12 = vadd.f32 %v379_v10, %v97_v11  ;;  %v415_v13 = vpop.f32.mrb[1].mxu0 }
  0xde   :  { %v100_v14 = vpop.f32.mrb[2].mxu0 }
  0xdf   :  { %v383_v15 = vmul.f32 -1.442695, %v98_v12  ;;  %v416_v16 = vpop.f32.mrb[3].mxu0 }
  0xe1   :  { %457 = vpow2.f32 %v383_v15 }
  0xeb   :  { %v458_v17 = vpop.eup %457 }
  0xec   :  { %v106_v18 = vadd.f32 1.0, %v458_v17 }
  0xee   :  { %459 = vrcp.f32 %v106_v18 }
  0xf8   :  { %v460_v19 = vpop.eup %459 }
  0xf9   :  { %424 = vmatmul.mubr.msk.f32.vlgmr.msra.gmra.mrb[0].mxu1 %vm119_vm3, %v460_v19 }
  0xfa   :  { %430 = vmatprep.mubr.msk.f32.mxu1 %vm494_vm0, %v493_v1  ;;  %447 = vmatpush3.bf16.msk.msra.mxu1 %vm446_vm6, %v445_v22 }
 0x1cc   :  { %v193_v24 = vpop.f32.mrb[0].mxu1 }
 0x1cd   :  { %v194_v25 = vadd.f32 %v384_v23, %v193_v24  ;;  %v425_v26 = vpop.f32.mrb[1].mxu1 }
 0x1cf   :  { %v387_v27 = vmul.f32 -1.442695, %v194_v25 }
 0x1d1   :  { %461 = vpow2.f32 %v387_v27 }
 0x1db   :  { %v462_v28 = vpop.eup %461 }
 0x1dc   :  { %v200_v29 = vadd.f32 1.0, %v462_v28 }
 0x1de   :  { %463 = vrcp.f32 %v200_v29 }
 0x1e8   :  { %v464_v30 = vpop.eup %463 }
 0x1e9   :  { %431 = vmatmul.mubr.msk.f32.vlgmr.msra.gmra.mrb[2].mxu1 %vm212_vm7, %v464_v30 }
 0x2bc   :  { %v286_v35 = vpop.f32.mrb[2].mxu1 }
 0x2bd   :  { %v287_v36 = vadd.f32 %v388_v34, %v286_v35  ;;  %v432_v37 = vpop.f32.mrb[3].mxu1 }
 0x2bf   :  { %v391_v38 = vmul.f32 -1.442695, %v287_v36 }
 0x2c1   :  { %465 = vpow2.f32 %v391_v38 }
 0x2cb   :  { %v466_v39 = vpop.eup %465 }
 0x2cc   :  { %v293_v40 = vadd.f32 1.0, %v466_v39 }
 0x2ce   :  { %467 = vrcp.f32 %v293_v40 }
 0x2d8   :  { %v468_v41 = vpop.eup %467 }
 0x2d9   :  { %v296_v42 = vpack.c.bf16 %v468_v41, %v468_v41 }
 0x2db   :  { %438 = vmatmul.mubr.msk.bf16.vlgmr.msra.gmra.mrb[4].mxu0 %vm119_vm3, %v296_v42 }
 0x3ae   :  { %v356_v44 = vpop.f32.mrb[4].mxu0 }
 0x3af   :  { %v357_v45 = vadd.f32 %v392_v43, %v356_v44  ;;  %v439_v46 = vpop.f32.mrb[5].mxu0 }
 0x3b0   :  { %v359_v47 = vpop.f32.mrb[6].mxu0 }
 0x3b1   :  { %v362_v48 = vpack.c.bf16 %v357_v45, %v357_v45  ;;  %v440_v49 = vpop.f32.mrb[7].mxu0 }
 0x3b3   :  { %364 = vst.msk [vmem:[#allocation2] sm:$0xf] %vm363_vm8, %v362_v48 }
 0x3b4   :  { %480 = shalt.err (!%p477_p4)
}
 0x3b5   :  { %s481_s12 = scalar_lea.hbm %s619_s9, 64 }
 0x3b6   :  { %p482_p5 = scmp.ne.s32.totalorder %s619_s9, %s481_s12  ;;  %p485_p6 = scmp.lt.u32.totalorder %s481_s12, %s619_s9 }
 0x3b8   :  { %p487_p7 = pnand %p485_p6, %p482_p5 }
 0x3ba   :  { %490 = shalt.err (!%p487_p7)
}
 0x3bb   :  { %374 = dma.vmem_to_hbm [thread:$0]  %s372_s10, 64, %s619_s9, [#allocation3]  }
 0x3bc   :  { %491 = dma.done.wait [#allocation3], 64  }
 0x3bd   :  { %492 = vsyncadd [#allocation3], 4294967232 }
 0x3be   :  { %378 = vsyncpa [#allocation3], 1 }

</bundles_post_ra>
